<compile_context>
chip_gen: v7x
topology: tpu7x:2x2x1
jax: 0.10.0
libtpu: 0.0.40
codegen_flags: <defaults>
</compile_context>

<pallas_src>
import functools

import jax
import jax.numpy as jnp
from jax import lax
from jax.experimental import pallas as pl
from jax.experimental.pallas import tpu as pltpu

_NUM_LAYERS = 6
_HIDDEN = 10


def _round_up(n, m):
    return -(-n // m) * m


def _encoder_kernel(x_ref, w1_ref, wr_ref, b1_ref, o_ref):
    """Full LargeEncoder forward for one batch tile.

    x_ref : (bb, input_dim)       input tile (batch-major, as stored in HBM)
    w1_ref: (HP, input_dim)       layer-1 W, PyTorch (out,in) layout, zero-padded
    wr_ref: (5, HP, HP)           layers 2..6 W, zero-padded, biases folded into
                                  the carrier column (col HP-1)
    b1_ref: (HP, 1)               layer-1 bias (f32), carrier row == 1.0
    o_ref : (bb, output_dim)      batch-major output tile (no wrapper transpose)
    """
    cdt = wr_ref.dtype                       # MXU operand dtype (follows x)

    x = x_ref[...].astype(cdt)               # (bb, in)

    # Layer 1, feature-major: z1 = W1 @ x^T -> (HP, bb); lanes = batch (dense).
    z = lax.dot_general(
        w1_ref[...], x,
        dimension_numbers=(((1,), (1,)), ((), ())),
        preferred_element_type=jnp.float32)
    z = z + b1_ref[...]                      # f32 bias; carrier row becomes 1.0
    h = jnp.maximum(z, 0.0)                  # f32 ReLU; carrier stays 1.0

    # Layers 2..5, feature-major. Biases ride the carrier column of wr, so each
    # layer is a single matmul + ReLU; padded rows stay exactly 0 and the
    # carrier row stays exactly 1 through every layer.
    for l in range(_NUM_LAYERS - 2):
        z = jnp.dot(wr_ref[l], h.astype(cdt),
                    preferred_element_type=jnp.float32)
        h = jnp.maximum(z, 0.0)

    # Layer 6 (no ReLU): contract the feature axis the other way round so the
    # MXU emits the result already batch-major (bb, HP) — no transpose, no extra
    # HBM pass. Its bias is also folded into the carrier column.
    z = lax.dot_general(
        h.astype(cdt), wr_ref[_NUM_LAYERS - 2],
        dimension_numbers=(((0,), (1,)), ((), ())),
        preferred_element_type=jnp.float32)

    o_ref[...] = z[:, : o_ref.shape[1]].astype(o_ref.dtype)


def _pick_block_batch(batch, bytes_per_row):
    """Batch tile: big enough to amortize the ~0.35 us/step overhead, small
    enough for >= 8 grid steps (>= 4 per TC on dual-TC v7x) and a comfortable
    double-buffered footprint inside v7x's 64 MiB physical VMEM."""
    if batch % 128 != 0:
        return batch                          # tiny / irregular batch: one tile
    # Double-buffered x-tile + out-tile budget (~24 MiB => plenty of headroom).
    cap = min(32768, (24 * 1024 * 1024) // max(1, 2 * bytes_per_row))
    candidates = [c for c in (32768, 16384, 8192, 4096, 2048, 1024, 512, 256, 128)
                  if c <= cap and batch % c == 0]
    for min_steps in (8, 4, 2):               # prefer >= 8 steps, relax if small
        for c in candidates:                  # largest first
            if batch // c >= min_steps:
                return c
    return batch                              # very small batch: single tile


def _pack_params(params, input_dim, hp, compute_dtype):
    """Pack the 6 (W, b) pairs (PyTorch (out,in) layout) into 3 padded slabs.

    Biases of layers 2..6 are folded into the carrier column (index hp-1) of the
    weight slabs; the layer-1 bias establishes the carrier constant 1.0 which
    survives every ReLU (ReLU(1) == 1), so padded rows stay exactly 0 and the
    folded biases act exactly like explicit bias adds.
    """
    carrier = hp - 1                          # a zero-padding hidden-feature row

    w1, b1 = params[0]
    w1_p = jnp.zeros((hp, input_dim), compute_dtype)
    w1_p = w1_p.at[: w1.shape[0], :].set(w1.astype(compute_dtype))

    b1_p = jnp.zeros((hp, 1), jnp.float32)
    b1_p = b1_p.at[: b1.shape[0], 0].set(b1.astype(jnp.float32))
    b1_p = b1_p.at[carrier, 0].set(1.0)       # carrier constant

    wr = jnp.zeros((_NUM_LAYERS - 1, hp, hp), compute_dtype)
    for l, (w, b) in enumerate(params[1:]):
        wr = wr.at[l, : w.shape[0], : w.shape[1]].set(w.astype(compute_dtype))
        # Fold bias into the carrier column: z[j] += b[j] * h[carrier] == b[j].
        wr = wr.at[l, : b.shape[0], carrier].set(b.astype(compute_dtype))
        if l < _NUM_LAYERS - 2:               # hidden layers: propagate the 1.0
            wr = wr.at[l, carrier, carrier].set(1.0)
    return w1_p, wr, b1_p


@functools.partial(jax.jit, static_argnames=("block_batch", "compute_dtype"))
def large_encoder_forward(x, params, *, block_batch=None, compute_dtype=None):
    """LargeEncoder forward via one Pallas TPU kernel.

    x:      (batch, input_dim). Pass bf16 from the producer to halve the
            dominant HBM read; f32 gives exact parity with the PyTorch forward
            (the kernel follows x's dtype for MXU operands — no wrapper astype).
    params: list of 6 (W, b); W in PyTorch (out_features, in_features) layout,
            b of shape (out_features,), f32.
    Returns (batch, output_dim) f32, batch-major (no post-kernel transpose).
    """
    batch, input_dim = x.shape
    output_dim = params[-1][0].shape[0]
    hp = _round_up(max(_HIDDEN, output_dim), 8)

    cdt = jnp.dtype(compute_dtype) if compute_dtype is not None else x.dtype

    bytes_per_row = input_dim * x.dtype.itemsize + output_dim * 4
    bb = block_batch if block_batch is not None else _pick_block_batch(
        batch, bytes_per_row)
    assert batch % bb == 0, "batch must be divisible by block_batch"
    assert bb == batch or bb % 128 == 0, \
        "block_batch must be a multiple of 128 (or the full batch)"
    grid = (batch // bb,)

    w1_p, wr, b1_p = _pack_params(params, input_dim, hp, cdt)

    out = pl.pallas_call(
        _encoder_kernel,
        out_shape=jax.ShapeDtypeStruct((batch, output_dim), jnp.float32),
        grid=grid,
        in_specs=[
            # x tiled along the batch; weights/bias are small resident blocks.
            pl.BlockSpec((bb, input_dim), lambda i: (i, 0)),
            pl.BlockSpec(w1_p.shape, lambda i: (0, 0)),
            pl.BlockSpec(wr.shape, lambda i: (0, 0, 0)),
            pl.BlockSpec(b1_p.shape, lambda i: (0, 0)),
        ],
        # Batch-major output written directly; the tiny last dim costs only a
        # few masked stores (≈16 B/row) vs. a whole extra HBM pass for `out.T`.
        out_specs=pl.BlockSpec((bb, output_dim), lambda i: (i, 0)),
        compiler_params=pltpu.CompilerParams(
            dimension_semantics=("parallel",),
            # Explicit scoped-VMEM budget: v5e defaults to 16 MiB which would
            # shrink pipelining once bb grows; even bb=32768 double-buffered
            # stays well under this and under v7x's 64 MiB physical VMEM.
            vmem_limit_bytes=48 * 1024 * 1024,
        ),
    )(x, w1_p, wr, b1_p)

    return out


def init_params(key, input_dim, output_dim):
    """nn.Linear-style init; W in PyTorch (out, in) layout, b of shape (out,)."""
    dims = [input_dim, 10, 10, 10, 10, 10, output_dim]
    params = []
    for i in range(_NUM_LAYERS):
        fan_in, fan_out = dims[i], dims[i + 1]
        key, kw, kb = jax.random.split(key, 3)
        bound = 1.0 / jnp.sqrt(fan_in)
        w = jax.random.uniform(kw, (fan_out, fan_in), jnp.float32, -bound, bound)
        b = jax.random.uniform(kb, (fan_out,), jnp.float32, -bound, bound)
        params.append((w, b))
    return params


def reference_forward(x, params):
    """Pure-JAX f32 reference matching the PyTorch forward."""
    h = x.astype(jnp.float32)
    for i, (w, b) in enumerate(params):
        z = jnp.dot(h, w.T, preferred_element_type=jnp.float32) + b
        h = jnp.maximum(z, 0.0) if i < len(params) - 1 else z
    return h


if __name__ == "__main__":
    key = jax.random.PRNGKey(0)
    k_x, k_p = jax.random.split(key)

    batch, input_dim, output_dim = 256, 32, 4
    x = jax.random.normal(k_x, (batch, input_dim), jnp.float32)
    params = init_params(k_p, input_dim, output_dim)

    out = large_encoder_forward(x, params)   # auto: block_batch=128 -> grid=(2,)
    out = jax.block_until_ready(out)
    assert out.shape == (batch, output_dim)

    ref = reference_forward(x, params)
    # f32 operands in the kernel -> only default-matmul-precision differences
    # between XLA and Mosaic remain; real bugs would show up as O(0.1-1) errors.
    assert jnp.allclose(out, ref, atol=2e-2, rtol=2e-2), \
        "mismatch vs f32 reference"

    print("KERNEL_OK")
</pallas_src>

<mosaic_0001>
module attributes {stable_mosaic.version = 11 : i64} {
  func.func @_encoder_kernel(%arg0: i32, %arg1: memref<128x32xf32, #tpu.memory_space<vmem>>, %arg2: memref<16x32xf32, #tpu.memory_space<vmem>>, %arg3: memref<5x16x16xf32, #tpu.memory_space<vmem>>, %arg4: memref<16x1xf32, #tpu.memory_space<vmem>>, %arg5: memref<128x4xf32, #tpu.memory_space<vmem>>) attributes {dimension_semantics = [#tpu.dimension_semantics<parallel>], iteration_bounds = array<i64: 2>, scalar_prefetch = 0 : i64, scratch_operands = 0 : i64, tpu.core_type = #tpu.core_type<tc>, window_params = [{transform_indices = @transform_0, window_bounds = array<i64: 128, 32>}, {pipeline_mode = #tpu.pipeline_mode<synchronous>, transform_indices = @transform_1, window_bounds = array<i64: 16, 32>}, {pipeline_mode = #tpu.pipeline_mode<synchronous>, transform_indices = @transform_2, window_bounds = array<i64: 5, 16, 16>}, {pipeline_mode = #tpu.pipeline_mode<synchronous>, transform_indices = @transform_3, window_bounds = array<i64: 16, 1>}, {transform_indices = @transform_4, window_bounds = array<i64: 128, 4>}]} {
    %c0 = arith.constant 0 : index
    %c0_0 = arith.constant 0 : index
    %0 = vector.load %arg1[%c0, %c0_0] : memref<128x32xf32, #tpu.memory_space<vmem>>, vector<128x32xf32>
    %c0_1 = arith.constant 0 : index
    %c0_2 = arith.constant 0 : index
    %1 = vector.load %arg2[%c0_1, %c0_2] : memref<16x32xf32, #tpu.memory_space<vmem>>, vector<16x32xf32>
    %cst = arith.constant dense<0.000000e+00> : vector<16x128xf32>
    %2 = tpu.matmul %1, %0, %cst {dimension_numbers = #tpu.dot_dimension_numbers<[1], [1], [0], [0], [0, 0, 1, 0], [], []>} : vector<16x32xf32>, vector<128x32xf32>, vector<16x128xf32> -> vector<16x128xf32>
    %c0_3 = arith.constant 0 : index
    %c0_4 = arith.constant 0 : index
    %3 = vector.load %arg4[%c0_3, %c0_4] : memref<16x1xf32, #tpu.memory_space<vmem>>, vector<16x1xf32>
    %4 = vector.broadcast %3 : vector<16x1xf32> to vector<16x128xf32>
    %5 = arith.addf %2, %4 : vector<16x128xf32>
    %cst_5 = arith.constant 0.000000e+00 : f32
    %6 = vector.broadcast %cst_5 : f32 to vector<16x128xf32>
    %7 = arith.maximumf %5, %6 : vector<16x128xf32>
    %c0_6 = arith.constant 0 : index
    %c0_7 = arith.constant 0 : index
    %c0_8 = arith.constant 0 : index
    %8 = vector.load %arg3[%c0_6, %c0_7, %c0_8] : memref<5x16x16xf32, #tpu.memory_space<vmem>>, vector<1x16x16xf32>
    %9 = vector.shape_cast %8 : vector<1x16x16xf32> to vector<16x16xf32>
    %cst_9 = arith.constant dense<0.000000e+00> : vector<16x128xf32>
    %10 = tpu.matmul %9, %7, %cst_9 {dimension_numbers = #tpu.dot_dimension_numbers<[1], [0], [0], [1], [0, 0, 1, 1], [], []>} : vector<16x16xf32>, vector<16x128xf32>, vector<16x128xf32> -> vector<16x128xf32>
    %cst_10 = arith.constant 0.000000e+00 : f32
    %11 = vector.broadcast %cst_10 : f32 to vector<16x128xf32>
    %12 = arith.maximumf %10, %11 : vector<16x128xf32>
    %c1 = arith.constant 1 : index
    %c0_11 = arith.constant 0 : index
    %c0_12 = arith.constant 0 : index
    %13 = vector.load %arg3[%c1, %c0_11, %c0_12] : memref<5x16x16xf32, #tpu.memory_space<vmem>>, vector<1x16x16xf32>
    %14 = vector.shape_cast %13 : vector<1x16x16xf32> to vector<16x16xf32>
    %cst_13 = arith.constant dense<0.000000e+00> : vector<16x128xf32>
    %15 = tpu.matmul %14, %12, %cst_13 {dimension_numbers = #tpu.dot_dimension_numbers<[1], [0], [0], [1], [0, 0, 1, 1], [], []>} : vector<16x16xf32>, vector<16x128xf32>, vector<16x128xf32> -> vector<16x128xf32>
    %cst_14 = arith.constant 0.000000e+00 : f32
    %16 = vector.broadcast %cst_14 : f32 to vector<16x128xf32>
    %17 = arith.maximumf %15, %16 : vector<16x128xf32>
    %c2 = arith.constant 2 : index
    %c0_15 = arith.constant 0 : index
    %c0_16 = arith.constant 0 : index
    %18 = vector.load %arg3[%c2, %c0_15, %c0_16] : memref<5x16x16xf32, #tpu.memory_space<vmem>>, vector<1x16x16xf32>
    %19 = vector.shape_cast %18 : vector<1x16x16xf32> to vector<16x16xf32>
    %cst_17 = arith.constant dense<0.000000e+00> : vector<16x128xf32>
    %20 = tpu.matmul %19, %17, %cst_17 {dimension_numbers = #tpu.dot_dimension_numbers<[1], [0], [0], [1], [0, 0, 1, 1], [], []>} : vector<16x16xf32>, vector<16x128xf32>, vector<16x128xf32> -> vector<16x128xf32>
    %cst_18 = arith.constant 0.000000e+00 : f32
    %21 = vector.broadcast %cst_18 : f32 to vector<16x128xf32>
    %22 = arith.maximumf %20, %21 : vector<16x128xf32>
    %c3 = arith.constant 3 : index
    %c0_19 = arith.constant 0 : index
    %c0_20 = arith.constant 0 : index
    %23 = vector.load %arg3[%c3, %c0_19, %c0_20] : memref<5x16x16xf32, #tpu.memory_space<vmem>>, vector<1x16x16xf32>
    %24 = vector.shape_cast %23 : vector<1x16x16xf32> to vector<16x16xf32>
    %cst_21 = arith.constant dense<0.000000e+00> : vector<16x128xf32>
    %25 = tpu.matmul %24, %22, %cst_21 {dimension_numbers = #tpu.dot_dimension_numbers<[1], [0], [0], [1], [0, 0, 1, 1], [], []>} : vector<16x16xf32>, vector<16x128xf32>, vector<16x128xf32> -> vector<16x128xf32>
    %cst_22 = arith.constant 0.000000e+00 : f32
    %26 = vector.broadcast %cst_22 : f32 to vector<16x128xf32>
    %27 = arith.maximumf %25, %26 : vector<16x128xf32>
    %c4 = arith.constant 4 : index
    %c0_23 = arith.constant 0 : index
    %c0_24 = arith.constant 0 : index
    %28 = vector.load %arg3[%c4, %c0_23, %c0_24] : memref<5x16x16xf32, #tpu.memory_space<vmem>>, vector<1x16x16xf32>
    %29 = vector.shape_cast %28 : vector<1x16x16xf32> to vector<16x16xf32>
    %cst_25 = arith.constant dense<0.000000e+00> : vector<128x16xf32>
    %30 = tpu.matmul %27, %29, %cst_25 {dimension_numbers = #tpu.dot_dimension_numbers<[0], [1], [1], [0], [0, 1, 1, 0], [], []>} : vector<16x128xf32>, vector<16x16xf32>, vector<128x16xf32> -> vector<128x16xf32>
    %31 = vector.extract_strided_slice %30 {offsets = [0, 0], sizes = [128, 4], strides = [1, 1]} : vector<128x16xf32> to vector<128x4xf32>
    %c0_26 = arith.constant 0 : index
    %c0_27 = arith.constant 0 : index
    %32 = vector.load %arg5[%c0_26, %c0_27] : memref<128x4xf32, #tpu.memory_space<vmem>>, vector<128x4xf32>
    tpu.vector_store %arg5[%c0_26, %c0_27], %31 {strides = array<i32>} : memref<128x4xf32, #tpu.memory_space<vmem>>, vector<128x4xf32>,
    return
  }
  func.func @transform_0(%arg0: i32) -> (i32, i32) {
    %c0_i32 = arith.constant 0 : i32
    %c0_i32_0 = arith.constant 0 : i32
    return %arg0, %c0_i32 : i32, i32
  }
  func.func @transform_1(%arg0: i32) -> (i32, i32) {
    %c0_i32 = arith.constant 0 : i32
    %c0_i32_0 = arith.constant 0 : i32
    %c0_i32_1 = arith.constant 0 : i32
    return %c0_i32, %c0_i32_0 : i32, i32
  }
  func.func @transform_2(%arg0: i32) -> (i32, i32, i32) {
    %c0_i32 = arith.constant 0 : i32
    %c0_i32_0 = arith.constant 0 : i32
    %c0_i32_1 = arith.constant 0 : i32
    %c0_i32_2 = arith.constant 0 : i32
    return %c0_i32, %c0_i32_0, %c0_i32_1 : i32, i32, i32
  }
  func.func @transform_3(%arg0: i32) -> (i32, i32) {
    %c0_i32 = arith.constant 0 : i32
    %c0_i32_0 = arith.constant 0 : i32
    %c0_i32_1 = arith.constant 0 : i32
    return %c0_i32, %c0_i32_0 : i32, i32
  }
  func.func @transform_4(%arg0: i32) -> (i32, i32) {
    %c0_i32 = arith.constant 0 : i32
    %c0_i32_0 = arith.constant 0 : i32
    return %arg0, %c0_i32 : i32, i32
  }
}

</mosaic_0001>

<bundles_post_ra>
// kernel: large_encoder_forward.1
= control target key start
LH: loop header
LB: loop body
LE: loop exit
PB: predicated region body
PF: predicated region fallthrough
CT: control target
= control target key end

     0   :  { %s1335_s15 = smov 0   ;;  %s1519_s0 = inlined_call_operand.vmem [shape: f32[256,32], index: 0, kind: input, shape index: {}]   ;;  %s1520_s1 = inlined_call_operand.vmem [shape: f32[16,32], index: 1, kind: input, shape index: {}]   ;;  %s1521_s2 = inlined_call_operand.vmem [shape: f32[5,16,16], index: 2, kind: input, shape index: {}]   ;;  %s1522_s3 = inlined_call_operand.vmem [shape: f32[16,1], index: 3, kind: input, shape index: {}]   ;;  %s1523_s4 = inlined_call_operand.vmem [shape: f32[256,4], index: 4, kind: output, shape index: {}]  }
   0x1 LB: > { %s1014_s16 = sadd.s32 4294967295, %s1307_s15   ;;  %p1018_p0 = scmp.ge.s32.totalorder %s1307_s15, 1  ;;  %s1307_s15 = sphi %s1335_s15, %s14_s15  }
   0x2   : > { %p163_p1 = scmp.lt.s32.totalorder %s1307_s15, 3 }
   0x4   : > { %p164_p2 = pnand %p1018_p0, %p163_p1 }
   0x5   : > { %s1019_s17 = sshll.u32 (!%p164_p2), %s1014_s16, 4  ;;  %vm231_vm0 = vcmask (!%p164_p2), 261120   ;;  %v217_v0 = vld [vmem:[%s1520_s1] sm:$0xff] (!%p164_p2)  ;;  %v1309_v2 = vmov (!%p164_p2), 0   ;;  %v220_v3 = vld [vmem:[%s1522_s3 + $0x8] sm:$0xff] (!%p164_p2)  ;;  %vm365_vm2 = vcmask (!%p164_p2), 130048  }
   0x6   : > { %167 = sbr.rel (%p164_p2) target bundleno = 1587 (0x633), region = 36  ;;  %v219_v1 = vld [vmem:[%s1522_s3] sm:$0xff] (!%p164_p2)  ;;  %p190_p3 = scmp.lt.s32.totalorder (!%p164_p2), %s1019_s17, 31  ;;  %1161 = vmatprep.mubr.msk.f32.mxu0 (!%p164_p2), %vm231_vm0, %v217_v0  ;;  %1300 = vset.pattern.permute.xlu0 (!%p164_p2), %v1309_v2  ;;  %vm1365_vm1 = vmpackc.low (!%p164_p2), %vm231_vm0, %vm231_vm0  ;;  %v218_v29 = vld [vmem:[%s1520_s1 + $0x8] sm:$0xff] (!%p164_p2)  ;;  %vm941_vm4 = vcmask (!%p164_p2), 31744  }
   0x7   : > { %223 = vperm.xlu0 (!%p164_p2), %1300, %v219_v1   ;;  %v363_v30 = vld [vmem:[%s1521_s2] sm:$0xff] (!%p164_p2)  ;;  %v364_v40 = vld [vmem:[%s1521_s2 + $0x8] sm:$0xff] (!%p164_p2)  ;;  %v1043_v41 = vld [vmem:[%s1521_s2 + $0x10] sm:$0xff] (!%p164_p2) }
   0x8   : > { %1168 = vmatprep.mubr.msk.f32.mxu1 (!%p164_p2), %vm365_vm2, %v363_v30  ;;  %v1044_v47 = vld [vmem:[%s1521_s2 + $0x18] sm:$0xff] (!%p164_p2)  ;;  %v1047_v48 = vld [vmem:[%s1521_s2 + $0x20] sm:$0xff] (!%p164_p2)  ;;  %v1048_v54 = vld [vmem:[%s1521_s2 + $0x28] sm:$0xff] (!%p164_p2) }
   0x9   : > { %v1051_v55 = vld [vmem:[%s1521_s2 + $0x30] sm:$0xff] (!%p164_p2)  ;;  %v1052_v61 = vld [vmem:[%s1521_s2 + $0x38] sm:$0xff] (!%p164_p2)  ;;  %v1055_v62 = vld [vmem:[%s1521_s2 + $0x40] sm:$0xff] (!%p164_p2) }
   0xa   : > { %v1056_v63 = vld [vmem:[%s1521_s2 + $0x48] sm:$0xff] (!%p164_p2)  ;;  %vm1285_vm3 = vmpackc.low (!%p164_p2), %vm365_vm2, %vm365_vm2 }
   0xb   : > { %228 = vperm.xlu0 (!%p164_p2), %1300, %v220_v3   ;;  %v1284_v0 = vpack.c.bf16 (!%p164_p2), %v1056_v63, %v1055_v62 }
   0xd   : > { %s1527_s17 = smov (!%p190_p3, %s1019_s17), 31 }
   0xe   : > { %s1020_s24 = sshll.u32 %s1527_s17, 3 }
   0xf   : > { %s1361_s27 = scalar_lea.vmem %s1519_s0, %s1020_s24  ;;  %s1482_s29 = scalar_lea.vmem %s1523_s4, %s1020_s24 }
  0x10   : > { %v201_v5 = vld [vmem:[%s1361_s27] sm:$0xff]  ;;  %v202_v6 = vld [vmem:[%s1361_s27 + $0x8] sm:$0xff]  ;;  %v203_v7 = vld [vmem:[%s1361_s27 + $0x10] sm:$0xff] }
  0x11   : > { %v1220_v8 = vpack.c.bf16 %v202_v6, %v201_v5  ;;  %v204_v9 = vld [vmem:[%s1361_s27 + $0x18] sm:$0xff]  ;;  %v205_v11 = vld [vmem:[%s1361_s27 + $0x20] sm:$0xff]  ;;  %v206_v12 = vld [vmem:[%s1361_s27 + $0x28] sm:$0xff] }
  0x12   : > { %v1226_v10 = vpack.c.bf16 %v204_v9, %v203_v7  ;;  %v1232_v13 = vpack.c.bf16 %v206_v12, %v205_v11  ;;  %v207_v14 = vld [vmem:[%s1361_s27 + $0x30] sm:$0xff]  ;;  %v208_v15 = vld [vmem:[%s1361_s27 + $0x38] sm:$0xff]  ;;  %v209_v17 = vld [vmem:[%s1361_s27 + $0x40] sm:$0xff] }
  0x13   : > { %1222 = vmatprep.subr.msk.bf16.mxu0 %vm1365_vm1, %v1220_v8  ;;  %v1238_v16 = vpack.c.bf16 %v208_v15, %v207_v14  ;;  %v210_v18 = vld [vmem:[%s1361_s27 + $0x48] sm:$0xff]  ;;  %v211_v20 = vld [vmem:[%s1361_s27 + $0x50] sm:$0xff]  ;;  %v212_v21 = vld [vmem:[%s1361_s27 + $0x58] sm:$0xff] }
  0x14   : > { %1225 = vmatpush3.bf16.xpose.msk.msra.mxu0 %vm1365_vm1, %v1220_v8  ;;  %v1244_v19 = vpack.c.bf16 %v210_v18, %v209_v17  ;;  %v1250_v22 = vpack.c.bf16 %v212_v21, %v211_v20  ;;  %v213_v23 = vld [vmem:[%s1361_s27 + $0x60] sm:$0xff]  ;;  %v214_v24 = vld [vmem:[%s1361_s27 + $0x68] sm:$0xff]  ;;  %v215_v26 = vld [vmem:[%s1361_s27 + $0x70] sm:$0xff] }
  0x15   : > { %1228 = vmatprep.subr.msk.bf16.mxu0 %vm1365_vm1, %v1226_v10  ;;  %v1256_v25 = vpack.c.bf16 %v214_v24, %v213_v23  ;;  %v216_v27 = vld [vmem:[%s1361_s27 + $0x78] sm:$0xff] }
  0x16   : > { %v1262_v28 = vpack.c.bf16 %v216_v27, %v215_v26 }
  0x1c   : > { %1231 = vmatpush3.bf16.xpose.msk.msra.mxu0 %vm1365_vm1, %v1226_v10 }
  0x1d   : > { %1234 = vmatprep.subr.msk.bf16.mxu0 %vm1365_vm1, %v1232_v13 }
  0x24   : > { %1237 = vmatpush3.bf16.xpose.msk.msra.mxu0 %vm1365_vm1, %v1232_v13 }
  0x25   : > { %1240 = vmatprep.subr.msk.bf16.mxu0 %vm1365_vm1, %v1238_v16 }
  0x2c   : > { %1243 = vmatpush3.bf16.xpose.msk.msra.mxu0 %vm1365_vm1, %v1238_v16 }
  0x2d   : > { %1246 = vmatprep.subr.msk.bf16.mxu0 %vm1365_vm1, %v1244_v19 }
  0x34   : > { %1249 = vmatpush3.bf16.xpose.msk.msra.mxu0 %vm1365_vm1, %v1244_v19 }
  0x35   : > { %1252 = vmatprep.subr.msk.bf16.mxu0 %vm1365_vm1, %v1250_v22 }
  0x3c   : > { %1255 = vmatpush3.bf16.xpose.msk.msra.mxu0 %vm1365_vm1, %v1250_v22 }
  0x3d   : > { %1258 = vmatprep.subr.msk.bf16.mxu0 %vm1365_vm1, %v1256_v25 }
  0x44   : > { %1261 = vmatpush3.bf16.xpose.msk.msra.mxu0 %vm1365_vm1, %v1256_v25 }
  0x45   : > { %1264 = vmatprep.subr.msk.bf16.mxu0 %vm1365_vm1, %v1262_v28 }
  0x4c   : > { %1267 = vmatpush3.bf16.xpose.msk.msra.mxu0 %vm1365_vm1, %v1262_v28 }
  0x53   : > { %1162 = vmatmul.mubr.msk.f32.vlgmr.msra.gmra.mrb[0].mxu0 %vm231_vm0, %v218_v29 }
  0x86   : > { %v224_v31 = vpop.permute.xlu0 %223 }
  0x8a   : > { %v229_v32 = vpop.permute.xlu0 %228 }
 0x126   : > { %v1163_v33 = vpop.f32.mrb[0].mxu0 }
 0x127   : > { %v358_v34 = vadd.f32 %v1163_v33, %v229_v32  ;;  %v352_v35 = vpop.f32.mrb[1].mxu0 }
 0x128   : > { %v353_v36 = vadd.f32 %v352_v35, %v224_v31 }
 0x129   : > { %v362_v37 = vmax.f32 %v358_v34, 0.0 }
 0x12a   : > { %v361_v38 = vmax.f32 %v353_v36, 0.0 }
 0x12c   : > { %v1268_v39 = vpack.c.bf16 %v362_v37, %v361_v38 }
 0x12e   : > { %1269 = vmatprep.subr.bf16.mxu1 %v1268_v39 }
 0x12f   : > { %1271 = vmatpush3.bf16.msra.mxu1 %v1268_v39 }
 0x132   : > { %1169 = vmatmul.mubr.msk.f32.vlgmr.msra.gmra.mrb[0].mxu1 %vm365_vm2, %v364_v40 }
 0x133   : > { %1175 = vmatprep.mubr.msk.f32.mxu1 %vm365_vm2, %v1043_v41 }
 0x205   : > { %v1170_v42 = vpop.f32.mrb[0].mxu1 }
 0x206   : > { %v448_v43 = vmax.f32 %v1170_v42, 0.0  ;;  %v438_v44 = vpop.f32.mrb[1].mxu1 }
 0x207   : > { %v447_v45 = vmax.f32 %v438_v44, 0.0 }
 0x209   : > { %v1272_v46 = vpack.c.bf16 %v448_v43, %v447_v45 }
 0x20b   : > { %1273 = vmatprep.subr.bf16.mxu1 %v1272_v46 }
 0x20c   : > { %1275 = vmatpush3.bf16.msra.mxu1 %v1272_v46 }
 0x20f   : > { %1176 = vmatmul.mubr.msk.f32.vlgmr.msra.gmra.mrb[2].mxu1 %vm365_vm2, %v1044_v47 }
 0x210   : > { %1182 = vmatprep.mubr.msk.f32.mxu1 %vm365_vm2, %v1047_v48 }
 0x2e2   : > { %v1177_v49 = vpop.f32.mrb[2].mxu1 }
 0x2e3   : > { %v534_v50 = vmax.f32 %v1177_v49, 0.0  ;;  %v524_v51 = vpop.f32.mrb[3].mxu1 }
 0x2e4   : > { %v533_v52 = vmax.f32 %v524_v51, 0.0 }
 0x2e6   : > { %v1276_v53 = vpack.c.bf16 %v534_v50, %v533_v52 }
 0x2e8   : > { %1277 = vmatprep.subr.bf16.mxu1 %v1276_v53 }
 0x2e9   : > { %1279 = vmatpush3.bf16.msra.mxu1 %v1276_v53 }
 0x2ec   : > { %1183 = vmatmul.mubr.msk.f32.vlgmr.msra.gmra.mrb[4].mxu1 %vm365_vm2, %v1048_v54 }
 0x2ed   : > { %1189 = vmatprep.mubr.msk.f32.mxu1 %vm365_vm2, %v1051_v55 }
 0x3bf   : > { %v1184_v56 = vpop.f32.mrb[4].mxu1 }
 0x3c0   : > { %v620_v57 = vmax.f32 %v1184_v56, 0.0  ;;  %v610_v58 = vpop.f32.mrb[5].mxu1 }
 0x3c1   : > { %v619_v59 = vmax.f32 %v610_v58, 0.0 }
 0x3c3   : > { %v1280_v60 = vpack.c.bf16 %v620_v57, %v619_v59 }
 0x3c5   : > { %1281 = vmatprep.subr.bf16.mxu1 %v1280_v60 }
 0x3c6   : > { %1283 = vmatpush3.bf16.msra.mxu1 %v1280_v60 }
 0x3c7   : > { %1286 = vmatprep.subr.msk.bf16.mxu1 %vm1285_vm3, %v1284_v0 }
 0x3c9   : > { %1190 = vmatmul.mubr.msk.f32.vlgmr.msra.gmra.mrb[6].mxu1 %vm365_vm2, %v1052_v61 }
 0x3cf   : > { %1289 = vmatpush3.bf16.xpose.msk.msra.mxu1 %vm1285_vm3, %v1284_v0 }
 0x49c   : > { %v1191_v1 = vpop.f32.mrb[6].mxu1 }
 0x49d   : > { %v696_v2 = vpop.f32.mrb[7].mxu1  ;;  %v706_v4 = vmax.f32 %v1191_v1, 0.0 }
 0x49e   : > { %v705_v3 = vmax.f32 %v696_v2, 0.0 }
 0x4a0   : > { %710 = vxpose.xlu1.b32.start [1/2] (short) %v705_v3, 128 }
 0x4a4   : > { %711 = vxpose.xlu1.b32.end [2/2] (short) %v706_v4, 128 }
 0x520   : > { %v726_v5 = vpop.trf.xlu1 }
 0x521   : > { %1196 = vmatprep.mubr.msk.f32.mxu1 %vm365_vm2, %v726_v5 }
 0x524   : > { %v727_v6 = vpop.trf.xlu1 }
 0x525   : > { %1197 = vmatmul.mubr.msk.f32.vlgmr.msra.gmra.mrb[8].mxu1 %vm365_vm2, %v727_v6 }
 0x528   : > { %v728_v7 = vpop.trf.xlu1 }
 0x529   : > { %1199 = vmatprep.mubr.msk.f32.mxu1 %vm365_vm2, %v728_v7 }
 0x52c   : > { %v729_v8 = vpop.trf.xlu1 }
 0x52d   : > { %1200 = vmatmul.mubr.msk.f32.gmra.mrb[10].mxu1 %vm365_vm2, %v729_v8 }
 0x530   : > { %v730_v9 = vpop.trf.xlu1 }
 0x531   : > { %1202 = vmatprep.mubr.msk.f32.mxu1 %vm365_vm2, %v730_v9 }
 0x534   : > { %v731_v10 = vpop.trf.xlu1 }
 0x535   : > { %1203 = vmatmul.mubr.msk.f32.gmra.mrb[12].mxu1 %vm365_vm2, %v731_v10 }
 0x538   : > { %v732_v11 = vpop.trf.xlu1 }
 0x539   : > { %1205 = vmatprep.mubr.msk.f32.mxu1 %vm365_vm2, %v732_v11 }
 0x53c   : > { %v733_v12 = vpop.trf.xlu1 }
 0x53d   : > { %1206 = vmatmul.mubr.msk.f32.gmra.mrb[14].mxu1 %vm365_vm2, %v733_v12 }
 0x540   : > { %v734_v13 = vpop.trf.xlu1 }
 0x541   : > { %1208 = vmatprep.mubr.msk.f32.mxu1 %vm365_vm2, %v734_v13 }
 0x544   : > { %v735_v14 = vpop.trf.xlu1 }
 0x545   : > { %1209 = vmatmul.mubr.msk.f32.gmra.mrb[16].mxu1 %vm365_vm2, %v735_v14 }
 0x548   : > { %v736_v15 = vpop.trf.xlu1 }
 0x549   : > { %1211 = vmatprep.mubr.msk.f32.mxu1 %vm365_vm2, %v736_v15 }
 0x54c   : > { %v737_v16 = vpop.trf.xlu1 }
 0x54d   : > { %1212 = vmatmul.mubr.msk.f32.gmra.mrb[18].mxu1 %vm365_vm2, %v737_v16 }
 0x550   : > { %v738_v17 = vpop.trf.xlu1 }
 0x551   : > { %1214 = vmatprep.mubr.msk.f32.mxu1 %vm365_vm2, %v738_v17 }
 0x554   : > { %v739_v18 = vpop.trf.xlu1 }
 0x555   : > { %1215 = vmatmul.mubr.msk.f32.gmra.mrb[20].mxu1 %vm365_vm2, %v739_v18 }
 0x558   : > { %v740_v19 = vpop.trf.xlu1 }
 0x559   : > { %1217 = vmatprep.mubr.msk.f32.mxu1 %vm365_vm2, %v740_v19 }
 0x55c   : > { %v741_v20 = vpop.trf.xlu1 }
 0x55d   : > { %1218 = vmatmul.mubr.msk.f32.gmra.mrb[22].mxu1 %vm365_vm2, %v741_v20 }
 0x5f8   : > { %v1198_v21 = vpop.f32.mrb[8].mxu1 }
 0x5f9   : > { %943 = vst.msk [vmem:[%s1482_s29 + $0x8] sm:$0xff] %vm941_vm4, %v1198_v21  ;;  %v862_v22 = vpop.f32.mrb[9].mxu1 }
 0x5fa   : > { %942 = vst.msk [vmem:[%s1482_s29] sm:$0xff] %vm941_vm4, %v862_v22 }
 0x600   : > { %v1201_v23 = vpop.f32.mrb[10].mxu1 }
 0x601   : > { %945 = vst.msk [vmem:[%s1482_s29 + $0x18] sm:$0xff] %vm941_vm4, %v1201_v23  ;;  %v872_v24 = vpop.f32.mrb[11].mxu1 }
 0x602   : > { %944 = vst.msk [vmem:[%s1482_s29 + $0x10] sm:$0xff] %vm941_vm4, %v872_v24 }
 0x608   : > { %v1204_v25 = vpop.f32.mrb[12].mxu1 }
 0x609   : > { %947 = vst.msk [vmem:[%s1482_s29 + $0x28] sm:$0xff] %vm941_vm4, %v1204_v25  ;;  %v882_v26 = vpop.f32.mrb[13].mxu1 }
 0x60a   : > { %946 = vst.msk [vmem:[%s1482_s29 + $0x20] sm:$0xff] %vm941_vm4, %v882_v26 }
 0x610   : > { %v1207_v27 = vpop.f32.mrb[14].mxu1 }
 0x611   : > { %949 = vst.msk [vmem:[%s1482_s29 + $0x38] sm:$0xff] %vm941_vm4, %v1207_v27  ;;  %v892_v28 = vpop.f32.mrb[15].mxu1 }
 0x612   : > { %948 = vst.msk [vmem:[%s1482_s29 + $0x30] sm:$0xff] %vm941_vm4, %v892_v28 }
 0x618   : > { %v1210_v29 = vpop.f32.mrb[16].mxu1 }
 0x619   : > { %951 = vst.msk [vmem:[%s1482_s29 + $0x48] sm:$0xff] %vm941_vm4, %v1210_v29  ;;  %v902_v30 = vpop.f32.mrb[17].mxu1 }
 0x61a   : > { %950 = vst.msk [vmem:[%s1482_s29 + $0x40] sm:$0xff] %vm941_vm4, %v902_v30 }
 0x620   : > { %v1213_v31 = vpop.f32.mrb[18].mxu1 }
 0x621   : > { %953 = vst.msk [vmem:[%s1482_s29 + $0x58] sm:$0xff] %vm941_vm4, %v1213_v31  ;;  %v912_v32 = vpop.f32.mrb[19].mxu1 }
 0x622   : > { %952 = vst.msk [vmem:[%s1482_s29 + $0x50] sm:$0xff] %vm941_vm4, %v912_v32 }
 0x628   : > { %v1216_v33 = vpop.f32.mrb[20].mxu1 }
 0x629   : > { %955 = vst.msk [vmem:[%s1482_s29 + $0x68] sm:$0xff] %vm941_vm4, %v1216_v33  ;;  %v922_v34 = vpop.f32.mrb[21].mxu1 }
 0x62a   : > { %954 = vst.msk [vmem:[%s1482_s29 + $0x60] sm:$0xff] %vm941_vm4, %v922_v34 }
 0x630   : > { %v1219_v35 = vpop.f32.mrb[22].mxu1 }
 0x631   : > { %957 = vst.msk [vmem:[%s1482_s29 + $0x78] sm:$0xff] %vm941_vm4, %v1219_v35  ;;  %v932_v36 = vpop.f32.mrb[23].mxu1 }
 0x632   : > { %956 = vst.msk [vmem:[%s1482_s29 + $0x70] sm:$0xff] %vm941_vm4, %v932_v36 }
 0x633 PF: > { %s14_s15 = sadd.s32 1, %s1307_s15  }
 0x634   : > { %p11_p4 = scmp.ge.s32.totalorder %s14_s15, 4  }
 0x636   :  { %13 = sbr.rel (!%p11_p4) target bundleno = 1 (0x1), region = 70 }

</bundles_post_ra>
